<compile_context>
chip_gen: v6e
topology: v6e:2x2x1
jax: 0.10.0
libtpu: 0.0.40
codegen_flags: <defaults>
</compile_context>

<pallas_src>
import functools

import jax
import jax.numpy as jnp
from jax.experimental import pallas as pl
from jax.experimental.pallas import tpu as pltpu


def _contrastive_kernel(text_ref, img_ref, out_ref,
                        t_norm_ref, col_acc_ref, row_loss_ref, diag_sum_ref,
                        *, inv_temperature, mxu_dtype):
    i = pl.program_id(0)
    n_tiles = pl.num_programs(0)
    tq = img_ref.shape[0]          # image rows per tile
    b = t_norm_ref.shape[0]        # full batch size
    eps_sq = 1e-24                 # (F.normalize eps=1e-12)^2 on sum-of-squares

    # ---- step 0: normalize text once, zero the accumulators -----------------
    @pl.when(i == 0)
    def _init():
        t = text_ref[...].astype(jnp.float32)
        t_ss = jnp.sum(t * t, axis=1, keepdims=True)
        t_n = t * jax.lax.rsqrt(jnp.maximum(t_ss, eps_sq))
        t_norm_ref[...] = t_n.astype(t_norm_ref.dtype)
        col_acc_ref[...] = jnp.zeros_like(col_acc_ref)
        row_loss_ref[...] = jnp.zeros_like(row_loss_ref)
        diag_sum_ref[...] = jnp.zeros_like(diag_sum_ref)

    # ---- per-tile: normalize image rows, fold in 1/temperature --------------
    img = img_ref[...].astype(jnp.float32)
    i_ss = jnp.sum(img * img, axis=1, keepdims=True)
    i_scaled = img * (jax.lax.rsqrt(jnp.maximum(i_ss, eps_sq))
                      * inv_temperature)                            # (TQ, D)

    # Logits tile on the MXU, contracting the shared D axis (no transpose).
    logits = jax.lax.dot_general(
        i_scaled.astype(mxu_dtype), t_norm_ref[...],
        dimension_numbers=(((1,), (1,)), ((), ())),
        preferred_element_type=jnp.float32)                         # (TQ, B)

    # Diagonal logits straight from the embeddings (labels == arange(B)).
    row0 = pl.multiple_of(i * tq, tq)
    t_rows = t_norm_ref[pl.ds(row0, tq), :].astype(jnp.float32)     # (TQ, D)
    diag = jnp.sum(i_scaled * t_rows, axis=1, keepdims=True)        # (TQ, 1)

    # One shared exp pass for both logsumexps; logits <= 1/T because both
    # operands are unit-norm, so exp(logits - 1/T) <= 1 (no overflow).
    shift = inv_temperature
    e = jnp.exp(logits - shift)                                     # (TQ, B)
    lse_r = shift + jnp.log(jnp.sum(e, axis=1, keepdims=True))      # (TQ, 1)

    row_loss_ref[...] += jnp.sum(lse_r - diag, keepdims=True)       # (1, 1)
    diag_sum_ref[...] += jnp.sum(diag, keepdims=True)               # (1, 1)
    col_acc_ref[...] += jnp.sum(e, axis=0, keepdims=True)           # (1, B)

    # ---- last step: finish the column (text-side) loss and combine ----------
    @pl.when(i == n_tiles - 1)
    def _finalize():
        lse_c = shift + jnp.log(col_acc_ref[...])                   # (1, B)
        loss_t_sum = jnp.sum(lse_c, keepdims=True) - diag_sum_ref[...]
        out_ref[...] = (0.5 / b) * (row_loss_ref[...] + loss_t_sum)


def contrastive_criterion(pooled_text, pooled_image, temperature=0.1,
                          block_rows=256, vmem_limit_bytes=None):
    """Pallas TPU implementation of ContrastiveCriterion.forward."""
    assert pooled_text.shape == pooled_image.shape
    assert pooled_text.ndim == 2
    B, D = pooled_text.shape

    # Lane-dense last dim: zero-padding D preserves L2 norms and dot products.
    d_pad = ((D + 127) // 128) * 128
    if d_pad != D:
        pad = ((0, 0), (0, d_pad - D))
        pooled_text = jnp.pad(pooled_text, pad)
        pooled_image = jnp.pad(pooled_image, pad)

    # Row tiles over the image side; pick the largest tile <= block_rows that
    # divides B (falls back to a single tile for awkward batch sizes).
    tq = B
    for cand in range(min(block_rows, B), 0, -1):
        if B % cand == 0:
            tq = cand
            break
    n_tiles = B // tq

    # bf16 inputs stay bf16 on the MXU; all vector math is done in f32.
    mxu_dtype = (jnp.bfloat16 if pooled_text.dtype == jnp.bfloat16
                 else jnp.float32)

    kernel = functools.partial(
        _contrastive_kernel,
        inv_temperature=float(1.0 / temperature),
        mxu_dtype=mxu_dtype)

    compiler_params = pltpu.CompilerParams(
        dimension_semantics=("arbitrary",),      # grid axis is a reduction
        vmem_limit_bytes=vmem_limit_bytes)

    out = pl.pallas_call(
        kernel,
        out_shape=jax.ShapeDtypeStruct((1, 1), jnp.float32),
        grid_spec=pltpu.PrefetchScalarGridSpec(
            num_scalar_prefetch=0,
            grid=(n_tiles,),
            in_specs=[
                pl.BlockSpec((B, d_pad), lambda i: (0, 0)),    # text (resident)
                pl.BlockSpec((tq, d_pad), lambda i: (i, 0)),   # image row tile
            ],
            out_specs=pl.BlockSpec((1, 1), lambda i: (0, 0)),
            scratch_shapes=[
                pltpu.VMEM((B, d_pad), mxu_dtype),   # normalized text
                pltpu.VMEM((1, B), jnp.float32),     # column sums of exp
                pltpu.VMEM((1, 1), jnp.float32),     # sum_rows (lse_r - diag)
                pltpu.VMEM((1, 1), jnp.float32),     # sum of diagonal logits
            ]),
        compiler_params=compiler_params,
    )(pooled_text, pooled_image)
    return out[0, 0]


def _reference(pooled_text, pooled_image, temperature=0.1):
    # Pure-JAX reference mirroring the PyTorch module (for sanity check).
    eps = 1e-12
    tn = pooled_text / jnp.maximum(
        jnp.linalg.norm(pooled_text, axis=1, keepdims=True), eps)
    im = pooled_image / jnp.maximum(
        jnp.linalg.norm(pooled_image, axis=1, keepdims=True), eps)
    logits = im @ tn.T / temperature
    b = logits.shape[0]
    labels = jnp.arange(b)
    lse_r = jax.scipy.special.logsumexp(logits, axis=1)
    lse_c = jax.scipy.special.logsumexp(logits, axis=0)
    diag = logits[labels, labels]
    loss_i = jnp.mean(lse_r - diag)
    loss_t = jnp.mean(lse_c - diag)
    return 0.5 * (loss_i + loss_t)


if __name__ == "__main__":
    key = jax.random.PRNGKey(0)
    k1, k2 = jax.random.split(key)
    B, D = 8, 32  # batch of pooled text/image embeddings
    pooled_text = jax.random.normal(k1, (B, D), dtype=jnp.float32)
    pooled_image = jax.random.normal(k2, (B, D), dtype=jnp.float32)

    loss = contrastive_criterion(pooled_text, pooled_image, temperature=0.1)
    loss = jax.block_until_ready(loss)

    ref = _reference(pooled_text, pooled_image, temperature=0.1)
    assert jnp.allclose(loss, ref, atol=1e-4, rtol=1e-4), (loss, ref)
    print("KERNEL_OK")
</pallas_src>

<mosaic_0001>
module attributes {stable_mosaic.version = 11 : i64} {
  func.func @_contrastive_kernel(%arg0: i32, %arg1: memref<8x128xf32, #tpu.memory_space<vmem>>, %arg2: memref<8x128xf32, #tpu.memory_space<vmem>>, %arg3: memref<1x1xf32, #tpu.memory_space<vmem>>, %arg4: memref<8x128xf32, #tpu.memory_space<vmem>>, %arg5: memref<1x8xf32, #tpu.memory_space<vmem>>, %arg6: memref<1x1xf32, #tpu.memory_space<vmem>>, %arg7: memref<1x1xf32, #tpu.memory_space<vmem>>) attributes {dimension_semantics = [#tpu.dimension_semantics<arbitrary>], iteration_bounds = array<i64: 1>, scalar_prefetch = 0 : i64, scratch_operands = 4 : i64, tpu.core_type = #tpu.core_type<tc>, window_params = [{pipeline_mode = #tpu.pipeline_mode<synchronous>, transform_indices = @transform_0, window_bounds = array<i64: 8, 128>}, {transform_indices = @transform_1, window_bounds = array<i64: 8, 128>}, {pipeline_mode = #tpu.pipeline_mode<synchronous>, transform_indices = @transform_2, window_bounds = array<i64: 1, 1>}]} {
    %c0_i32 = arith.constant 0 : i32
    %0 = arith.cmpi eq, %arg0, %c0_i32 : i32
    %1 = arith.extui %0 : i1 to i32
    %c0_i32_0 = arith.constant 0 : i32
    %2 = arith.cmpi ne, %1, %c0_i32_0 : i32
    scf.if %2 {
      %c0_29 = arith.constant 0 : index
      %c0_30 = arith.constant 0 : index
      %56 = vector.load %arg1[%c0_29, %c0_30] : memref<8x128xf32, #tpu.memory_space<vmem>>, vector<8x128xf32>
      %57 = arith.mulf %56, %56 : vector<8x128xf32>
      %cst_31 = arith.constant dense<0.000000e+00> : vector<8xf32>
      %58 = vector.multi_reduction <add>, %57, %cst_31 [1] : vector<8x128xf32> to vector<8xf32>
      %59 = vector.shape_cast %58 : vector<8xf32> to vector<8x1xf32>
      %cst_32 = arith.constant 1.000000e-24 : f32
      %60 = vector.broadcast %cst_32 : f32 to vector<8x1xf32>
      %61 = arith.maximumf %59, %60 : vector<8x1xf32>
      %62 = math.rsqrt %61 : vector<8x1xf32>
      %63 = vector.broadcast %62 : vector<8x1xf32> to vector<8x128xf32>
      %64 = arith.mulf %56, %63 : vector<8x128xf32>
      %c0_33 = arith.constant 0 : index
      %c0_34 = arith.constant 0 : index
      %65 = vector.load %arg4[%c0_33, %c0_34] : memref<8x128xf32, #tpu.memory_space<vmem>>, vector<8x128xf32>
      tpu.vector_store %arg4[%c0_33, %c0_34], %64 {strides = array<i32>} : memref<8x128xf32, #tpu.memory_space<vmem>>, vector<8x128xf32>,
      %cst_35 = arith.constant 0.000000e+00 : f32
      %66 = vector.broadcast %cst_35 : f32 to vector<1x8xf32>
      %c0_36 = arith.constant 0 : index
      %c0_37 = arith.constant 0 : index
      %67 = vector.load %arg5[%c0_36, %c0_37] : memref<1x8xf32, #tpu.memory_space<vmem>>, vector<1x8xf32>
      tpu.vector_store %arg5[%c0_36, %c0_37], %66 {strides = array<i32>} : memref<1x8xf32, #tpu.memory_space<vmem>>, vector<1x8xf32>,
      %cst_38 = arith.constant 0.000000e+00 : f32
      %68 = vector.broadcast %cst_38 : f32 to vector<1x1xf32>
      %c0_39 = arith.constant 0 : index
      %c0_40 = arith.constant 0 : index
      %69 = vector.load %arg6[%c0_39, %c0_40] : memref<1x1xf32, #tpu.memory_space<vmem>>, vector<1x1xf32>
      tpu.vector_store %arg6[%c0_39, %c0_40], %68 {strides = array<i32>} : memref<1x1xf32, #tpu.memory_space<vmem>>, vector<1x1xf32>,
      %cst_41 = arith.constant 0.000000e+00 : f32
      %70 = vector.broadcast %cst_41 : f32 to vector<1x1xf32>
      %c0_42 = arith.constant 0 : index
      %c0_43 = arith.constant 0 : index
      %71 = vector.load %arg7[%c0_42, %c0_43] : memref<1x1xf32, #tpu.memory_space<vmem>>, vector<1x1xf32>
      tpu.vector_store %arg7[%c0_42, %c0_43], %70 {strides = array<i32>} : memref<1x1xf32, #tpu.memory_space<vmem>>, vector<1x1xf32>,
    } else {
    }
    %c0 = arith.constant 0 : index
    %c0_1 = arith.constant 0 : index
    %3 = vector.load %arg2[%c0, %c0_1] : memref<8x128xf32, #tpu.memory_space<vmem>>, vector<8x128xf32>
    %4 = arith.mulf %3, %3 : vector<8x128xf32>
    %cst = arith.constant dense<0.000000e+00> : vector<8xf32>
    %5 = vector.multi_reduction <add>, %4, %cst [1] : vector<8x128xf32> to vector<8xf32>
    %6 = vector.shape_cast %5 : vector<8xf32> to vector<8x1xf32>
    %cst_2 = arith.constant 1.000000e-24 : f32
    %7 = vector.broadcast %cst_2 : f32 to vector<8x1xf32>
    %8 = arith.maximumf %6, %7 : vector<8x1xf32>
    %9 = math.rsqrt %8 : vector<8x1xf32>
    %cst_3 = arith.constant 1.000000e+01 : f32
    %10 = vector.broadcast %cst_3 : f32 to vector<8x1xf32>
    %11 = arith.mulf %9, %10 : vector<8x1xf32>
    %12 = vector.broadcast %11 : vector<8x1xf32> to vector<8x128xf32>
    %13 = arith.mulf %3, %12 : vector<8x128xf32>
    %c0_4 = arith.constant 0 : index
    %c0_5 = arith.constant 0 : index
    %14 = vector.load %arg4[%c0_4, %c0_5] : memref<8x128xf32, #tpu.memory_space<vmem>>, vector<8x128xf32>
    %cst_6 = arith.constant dense<0.000000e+00> : vector<8x8xf32>
    %15 = tpu.matmul %13, %14, %cst_6 {dimension_numbers = #tpu.dot_dimension_numbers<[1], [1], [0], [0], [0, 0, 1, 0], [], []>} : vector<8x128xf32>, vector<8x128xf32>, vector<8x8xf32> -> vector<8x8xf32>
    %c8_i32 = arith.constant 8 : i32
    %16 = arith.muli %arg0, %c8_i32 : i32
    %17 = tpu.assume_multiple %16, 8 : i32
    %18 = arith.index_cast %17 : i32 to index
    %c0_7 = arith.constant 0 : index
    %19 = vector.load %arg4[%18, %c0_7] : memref<8x128xf32, #tpu.memory_space<vmem>>, vector<8x128xf32>
    %20 = arith.mulf %13, %19 : vector<8x128xf32>
    %cst_8 = arith.constant dense<0.000000e+00> : vector<8xf32>
    %21 = vector.multi_reduction <add>, %20, %cst_8 [1] : vector<8x128xf32> to vector<8xf32>
    %22 = vector.shape_cast %21 : vector<8xf32> to vector<8x1xf32>
    %cst_9 = arith.constant 1.000000e+01 : f32
    %23 = vector.broadcast %cst_9 : f32 to vector<8x8xf32>
    %24 = arith.subf %15, %23 : vector<8x8xf32>
    %25 = math.exp %24 : vector<8x8xf32>
    %cst_10 = arith.constant dense<0.000000e+00> : vector<8xf32>
    %26 = vector.multi_reduction <add>, %25, %cst_10 [1] : vector<8x8xf32> to vector<8xf32>
    %27 = vector.shape_cast %26 : vector<8xf32> to vector<8x1xf32>
    %28 = math.log %27 : vector<8x1xf32>
    %cst_11 = arith.constant 1.000000e+01 : f32
    %29 = vector.broadcast %cst_11 : f32 to vector<8x1xf32>
    %30 = arith.addf %29, %28 : vector<8x1xf32>
    %c0_12 = arith.constant 0 : index
    %c0_13 = arith.constant 0 : index
    %31 = vector.load %arg6[%c0_12, %c0_13] : memref<1x1xf32, #tpu.memory_space<vmem>>, vector<1x1xf32>
    %32 = arith.subf %30, %22 : vector<8x1xf32>
    %33 = vector.shape_cast %32 : vector<8x1xf32> to vector<1x8x1xf32>
    %cst_14 = arith.constant dense<0.000000e+00> : vector<1xf32>
    %34 = vector.multi_reduction <add>, %33, %cst_14 [1, 2] : vector<1x8x1xf32> to vector<1xf32>
    %35 = vector.shape_cast %34 : vector<1xf32> to vector<1x1x1xf32>
    %36 = vector.extract %35[0, 0, 0] : f32 from vector<1x1x1xf32>
    %37 = vector.broadcast %36 : f32 to vector<1x1xf32>
    %38 = arith.addf %31, %37 : vector<1x1xf32>
    %c0_15 = arith.constant 0 : index
    %c0_16 = arith.constant 0 : index
    %39 = vector.load %arg6[%c0_15, %c0_16] : memref<1x1xf32, #tpu.memory_space<vmem>>, vector<1x1xf32>
    tpu.vector_store %arg6[%c0_15, %c0_16], %38 {strides = array<i32>} : memref<1x1xf32, #tpu.memory_space<vmem>>, vector<1x1xf32>,
    %c0_17 = arith.constant 0 : index
    %c0_18 = arith.constant 0 : index
    %40 = vector.load %arg7[%c0_17, %c0_18] : memref<1x1xf32, #tpu.memory_space<vmem>>, vector<1x1xf32>
    %41 = vector.shape_cast %22 : vector<8x1xf32> to vector<1x8x1xf32>
    %cst_19 = arith.constant dense<0.000000e+00> : vector<1xf32>
    %42 = vector.multi_reduction <add>, %41, %cst_19 [1, 2] : vector<1x8x1xf32> to vector<1xf32>
    %43 = vector.shape_cast %42 : vector<1xf32> to vector<1x1x1xf32>
    %44 = vector.extract %43[0, 0, 0] : f32 from vector<1x1x1xf32>
    %45 = vector.broadcast %44 : f32 to vector<1x1xf32>
    %46 = arith.addf %40, %45 : vector<1x1xf32>
    %c0_20 = arith.constant 0 : index
    %c0_21 = arith.constant 0 : index
    %47 = vector.load %arg7[%c0_20, %c0_21] : memref<1x1xf32, #tpu.memory_space<vmem>>, vector<1x1xf32>
    tpu.vector_store %arg7[%c0_20, %c0_21], %46 {strides = array<i32>} : memref<1x1xf32, #tpu.memory_space<vmem>>, vector<1x1xf32>,
    %c0_22 = arith.constant 0 : index
    %c0_23 = arith.constant 0 : index
    %48 = vector.load %arg5[%c0_22, %c0_23] : memref<1x8xf32, #tpu.memory_space<vmem>>, vector<1x8xf32>
    %cst_24 = arith.constant dense<0.000000e+00> : vector<8xf32>
    %49 = vector.multi_reduction <add>, %25, %cst_24 [0] : vector<8x8xf32> to vector<8xf32>
    %50 = vector.shape_cast %49 : vector<8xf32> to vector<1x8xf32>
    %51 = arith.addf %48, %50 : vector<1x8xf32>
    %c0_25 = arith.constant 0 : index
    %c0_26 = arith.constant 0 : index
    %52 = vector.load %arg5[%c0_25, %c0_26] : memref<1x8xf32, #tpu.memory_space<vmem>>, vector<1x8xf32>
    tpu.vector_store %arg5[%c0_25, %c0_26], %51 {strides = array<i32>} : memref<1x8xf32, #tpu.memory_space<vmem>>, vector<1x8xf32>,
    %c0_i32_27 = arith.constant 0 : i32
    %53 = arith.cmpi eq, %arg0, %c0_i32_27 : i32
    %54 = arith.extui %53 : i1 to i32
    %c0_i32_28 = arith.constant 0 : i32
    %55 = arith.cmpi ne, %54, %c0_i32_28 : i32
    scf.if %55 {
      %c0_29 = arith.constant 0 : index
      %c0_30 = arith.constant 0 : index
      %56 = vector.load %arg5[%c0_29, %c0_30] : memref<1x8xf32, #tpu.memory_space<vmem>>, vector<1x8xf32>
      %57 = math.log %56 : vector<1x8xf32>
      %cst_31 = arith.constant 1.000000e+01 : f32
      %58 = vector.broadcast %cst_31 : f32 to vector<1x8xf32>
      %59 = arith.addf %58, %57 : vector<1x8xf32>
      %60 = vector.shape_cast %59 : vector<1x8xf32> to vector<1x1x8xf32>
      %cst_32 = arith.constant dense<0.000000e+00> : vector<1xf32>
      %61 = vector.multi_reduction <add>, %60, %cst_32 [1, 2] : vector<1x1x8xf32> to vector<1xf32>
      %62 = vector.shape_cast %61 : vector<1xf32> to vector<1x1x1xf32>
      %63 = vector.extract %62[0, 0, 0] : f32 from vector<1x1x1xf32>
      %64 = vector.broadcast %63 : f32 to vector<1x1xf32>
      %c0_33 = arith.constant 0 : index
      %c0_34 = arith.constant 0 : index
      %65 = vector.load %arg7[%c0_33, %c0_34] : memref<1x1xf32, #tpu.memory_space<vmem>>, vector<1x1xf32>
      %66 = arith.subf %64, %65 : vector<1x1xf32>
      %c0_35 = arith.constant 0 : index
      %c0_36 = arith.constant 0 : index
      %67 = vector.load %arg6[%c0_35, %c0_36] : memref<1x1xf32, #tpu.memory_space<vmem>>, vector<1x1xf32>
      %68 = arith.addf %67, %66 : vector<1x1xf32>
      %cst_37 = arith.constant 6.250000e-02 : f32
      %69 = vector.broadcast %cst_37 : f32 to vector<1x1xf32>
      %70 = arith.mulf %69, %68 : vector<1x1xf32>
      %c0_38 = arith.constant 0 : index
      %c0_39 = arith.constant 0 : index
      %71 = vector.load %arg3[%c0_38, %c0_39] : memref<1x1xf32, #tpu.memory_space<vmem>>, vector<1x1xf32>
      tpu.vector_store %arg3[%c0_38, %c0_39], %70 {strides = array<i32>} : memref<1x1xf32, #tpu.memory_space<vmem>>, vector<1x1xf32>,
    } else {
    }
    return
  }
  func.func @transform_0(%arg0: i32) -> (i32, i32) {
    %c0_i32 = arith.constant 0 : i32
    %c0_i32_0 = arith.constant 0 : i32
    %c0_i32_1 = arith.constant 0 : i32
    return %c0_i32, %c0_i32_0 : i32, i32
  }
  func.func @transform_1(%arg0: i32) -> (i32, i32) {
    %c0_i32 = arith.constant 0 : i32
    %c0_i32_0 = arith.constant 0 : i32
    return %arg0, %c0_i32 : i32, i32
  }
  func.func @transform_2(%arg0: i32) -> (i32, i32) {
    %c0_i32 = arith.constant 0 : i32
    %c0_i32_0 = arith.constant 0 : i32
    %c0_i32_1 = arith.constant 0 : i32
    return %c0_i32, %c0_i32_0 : i32, i32
  }
}

</mosaic_0001>

<bundles_post_ra>
// kernel: tpu_custom_call.1
= control target key start
LH: loop header
LB: loop body
LE: loop exit
PB: predicated region body
PF: predicated region fallthrough
CT: control target
= control target key end

     0   :  { %7 = vsyncpa [#allocation7], 0  ;;  %s361_s0 = inlined_call_operand.hbm [shape: f32[8,128], index: 0, kind: input, shape index: {}]   ;;  %s362_s1 = inlined_call_operand.hbm [shape: f32[8,128], index: 1, kind: input, shape index: {}]   ;;  %s363_s2 = inlined_call_operand.hbm [shape: f32[1,1], index: 2, kind: output, shape index: {}]  }
   0x1   :  { %8 = vsyncpa [#allocation10], 0 }
   0x2   :  { %9 = vsyncpa [#allocation8], 0  ;;  %s324_s9 = smov [#allocation6]   ;;  %s325_s11 = smov [#allocation9]  }
   0x3   :  { %s16_s10 = sshll.u32 %s324_s9, 4  ;;  %s26_s12 = sshll.u32 %s325_s11, 4  ;;  %s17_s10 = int_to_ptr.vmem [resolvable:$true] %s16_s10  ;;  %s27_s12 = int_to_ptr.vmem [resolvable:$true] %s26_s12 }
   0x4   :  { %s266_s13 = scalar_lea.vmem %s17_s10, 128  ;;  %p271_p1 = scmp.lt.s32.totalorder %s17_s10, %s17_s10 }
   0x5   :  { %p267_p0 = scmp.ne.s32.totalorder %s17_s10, %s266_s13  ;;  %p272_p2 = scmp.lt.s32.totalorder %s266_s13, %s266_s13 }
   0x7   :  { %p273_p3 = por %p272_p2, %p271_p1 }
   0x9   :  { %p274_p4 = pnand %p273_p3, %p267_p0 }
   0xb   :  { %277 = shalt.err (!%p274_p4)
}
   0xc   :  { %19 = dma.hbm_to_vmem [thread:$0]  %s361_s0, 128, %s17_s10, [#allocation7]  }
   0xd   :  { %s286_s16 = scalar_lea.vmem %s27_s12, 128  ;;  %p291_p6 = scmp.lt.s32.totalorder %s27_s12, %s27_s12 }
   0xe   :  { %p287_p5 = scmp.ne.s32.totalorder %s27_s12, %s286_s16  ;;  %p292_p7 = scmp.lt.s32.totalorder %s286_s16, %s286_s16 }
  0x10   :  { %p293_p8 = por %p292_p7, %p291_p6 }
  0x12   :  { %p294_p9 = pnand %p293_p8, %p287_p5 }
  0x14   :  { %297 = shalt.err (!%p294_p9)
}
  0x15   :  { %29 = dma.hbm_to_vmem [thread:$0]  %s362_s1, 128, %s27_s12, [#allocation10]  }
  0x16   :  { %318 = dma.done.wait [#allocation7], 128  }
  0x17   :  { %319 = vsyncadd [#allocation7], 4294967168 }
  0x18   :  { %320 = dma.done.wait [#allocation10], 128  }
  0x19   :  { %321 = vsyncadd [#allocation10], 4294967168  ;;  %v40_v0 = vld [vmem:[#allocation6] sm:$0xff]  ;;  %v53_v1 = vld [vmem:[#allocation9] sm:$0xff]  ;;  %v326_v4 = vmov 0.0   ;;  %vm327_vm0 = vmmov 0  }
  0x1a   :  { %v41_v2 = vmul.f32 %v40_v0, %v40_v0  ;;  %v54_v3 = vmul.f32 %v53_v1, %v53_v1  ;;  %232 = vmatprep.subr.mxu0 %v326_v4  ;;  %234 = vmatprep.mubr.msk.f32.mxu0 %vm327_vm0, %v326_v4  ;;  %vm48_vm1 = vcmask 57344   ;;  %vm141_vm2 = vcmask 64512   ;;  %s328_s20 = smov [#allocation11]  }
  0x1b   :  { %49 = vst.msk [vmem:[#allocation3] sm:$0x1] %vm48_vm1, %v326_v4  ;;  %vm150_vm3 = vcmask 7168   ;;  %vm50_vm4 = vcmask 0   ;;  %s219_s21 = sshll.u32 %s328_s20, 4  ;;  %s220_s21 = int_to_ptr.vmem [resolvable:$true] %s219_s21 }
  0x1c   :  { %42 = vadd.xlane.f32.xlu0 %v41_v2  ;;  %51 = vst.msk [vmem:[#allocation4] sm:$0x1] %vm50_vm4, %v326_v4  ;;  %52 = vst.msk [vmem:[#allocation5] sm:$0x1] %vm50_vm4, %v326_v4  ;;  %s298_s22 = scalar_lea.vmem %s220_s21, 16  ;;  %s302_s23 = scalar_lea.vmem %s220_s21, 32 }
  0x1d   :  { %p299_p10 = scmp.ne.s32.totalorder %s220_s21, %s298_s22  ;;  %p303_p11 = scmp.lt.s32.totalorder %s220_s21, %s220_s21 }
  0x1e   :  { %p304_p12 = scmp.lt.s32.totalorder %s302_s23, %s298_s22 }
  0x20   :  { %55 = vadd.xlane.f32.xlu0 %v54_v3  ;;  %p305_p13 = por %p304_p12, %p303_p11 }
  0x22   :  { %v179_v26 = vld [vmem:[#allocation3] sm:$0x1]  ;;  %p306_p0 = pnand %p305_p13, %p299_p10 }
  0x23   :  { %v148_v63 = vld [vmem:[#allocation4] sm:$0x1] }
  0xa5   :  { %v43_v5 = vpop.xlane.xlu0 %42 }
  0xa6   :  { %v44_v6 = vmax.f32 %v43_v5, 1e-24 }
  0xa8   :  { %248 = vrsqrt.f32 %v44_v6 }
  0xa9   :  { %v56_v7 = vpop.xlane.xlu0 %55 }
  0xaa   :  { %v57_v8 = vmax.f32 %v56_v7, 1e-24 }
  0xac   :  { %250 = vrsqrt.f32 %v57_v8 }
  0xb5   :  { %v249_v9 = vpop.eup %248 }
  0xb6   :  { %v46_v10 = vmul.f32 %v249_v9, %v40_v0  ;;  %v165_v0 = vld [vmem:[#allocation5] sm:$0x1] }
  0xb8   :  { %233 = vmatpush3.xpose.msra.mxu0 %v46_v10 }
  0xb9   :  { %v251_v11 = vpop.eup %250 }
  0xba   :  { %v59_v12 = vmul.f32 10.0, %v251_v11 }
  0xbc   :  { %v60_v13 = vmul.f32 %v59_v12, %v53_v1 }
  0xbe   :  { %235 = vmatmul.mubr.f32.vlgmr.msra.gmra.mxu0 %v60_v13  ;;  %v135_v14 = vmul.f32 %v60_v13, %v46_v10 }
 0x17e   :  { %v128_v15 = vpop.f32.mrf.mxu0 }
 0x17f   :  { %v229_v16 = vadd.f32 -10.0, %v128_v15 }
 0x180   :  { %v236_v17 = vpop.f32.mrf.mxu0 }
 0x181   :  { %v139_v18 = vmul.f32 1.442695, %v229_v16 }
 0x183   :  { %252 = vpow2.f32 %v139_v18 }
 0x190   :  { %v253_v19 = vpop.eup %252 }
 0x191   :  { %v142_v20 = vsel %vm141_vm2, %v253_v19, 0.0 }
 0x192   :  { %143 = vadd.xlane.f32.xlu1 %v142_v20  ;;  %v180_v21 = vrot.slane %v142_v20, 4 }
 0x194   :  { %v181_v22 = vadd.f32 %v180_v21, %v142_v20 }
 0x196   :  { %v182_v23 = vrot.slane %v181_v22, 2  ;;  %136 = vadd.xlane.f32.xlu1 %v135_v14 }
 0x198   :  { %v183_v24 = vadd.f32 %v182_v23, %v181_v22 }
 0x19a   :  { %v184_v25 = vrot.slane %v183_v24, 1 }
 0x19c   :  { %v185_v27 = vadd.f32 %v184_v25, %v183_v24 }
 0x19e   :  { %v186_v28 = vadd.f32 %v185_v27, %v179_v26 }
 0x1a0   :  { %188 = vst.msk [vmem:[#allocation3] sm:$0x1] %vm48_vm1, %v186_v28 }
 0x1a7   :  { %v192_v29 = vld [vmem:[#allocation3] sm:$0x1] }
 0x1a8   :  { %254 = vlog2.f32 %v192_v29 }
 0x1b5   :  { %v255_v33 = vpop.eup %254 }
 0x1b6   :  { %v194_v37 = vmul.f32 0.6931472, %v255_v33 }
 0x1b8   :  { %v195_v40 = vadd.f32 10.0, %v194_v37 }
 0x1ba   :  { %v196_v41 = vsel %vm48_vm1, %v195_v40, 0.0 }
 0x21b   :  { %v144_v30 = vpop.xlane.xlu1 %143 }
 0x21c   :  { %256 = vlog2.f32 %v144_v30 }
 0x21f   :  { %v137_v31 = vpop.xlane.xlu1 %136 }
 0x220   :  { %v166_v32 = vsel %vm150_vm3, %v137_v31, 0.0 }
 0x221   :  { %167 = vadd.xlane.f32.xlu1 %v166_v32 }
 0x229   :  { %v257_v34 = vpop.eup %256 }
 0x22a   :  { %v146_v35 = vmul.f32 0.6931472, %v257_v34 }
 0x22c   :  { %v147_v36 = vadd.f32 10.0, %v146_v35 }
 0x22e   :  { %v149_v38 = vsub.f32 %v147_v36, %v137_v31 }
 0x230   :  { %v151_v39 = vsel %vm150_vm3, %v149_v38, 0.0 }
 0x231   :  { %152 = vadd.xlane.f32.xlu0 %v151_v39 }
 0x235   :  { %197 = vadd.xlane.f32.xlu0 %v196_v41 }
 0x2aa   :  { %v168_v42 = vpop.xlane.xlu1 %167 }
 0x2ab   :  { %v169_v43 = vrot.slane %v168_v42, 4 }
 0x2ad   :  { %v170_v44 = vadd.f32 %v169_v43, %v168_v42 }
 0x2af   :  { %v171_v45 = vrot.slane %v170_v44, 2 }
 0x2b1   :  { %v172_v49 = vadd.f32 %v171_v45, %v170_v44 }
 0x2b3   :  { %v173_v55 = vrot.slane %v172_v49, 1 }
 0x2b5   :  { %v174_v60 = vadd.f32 %v173_v55, %v172_v49 }
 0x2ba   :  { %v153_v46 = vpop.xlane.xlu0 %152 }
 0x2bb   :  { %v154_v47 = vrot.slane %v153_v46, 4 }
 0x2bd   :  { %v155_v48 = vadd.f32 %v154_v47, %v153_v46 }
 0x2be   :  { %v198_v50 = vpop.xlane.xlu0 %197 }
 0x2bf   :  { %v156_v51 = vrot.slane %v155_v48, 2  ;;  %v199_v52 = vrot.slane %v198_v50, 4 }
 0x2c1   :  { %v200_v53 = vadd.f32 %v199_v52, %v198_v50  ;;  %v157_v54 = vadd.f32 %v156_v51, %v155_v48 }
 0x2c3   :  { %v201_v56 = vrot.slane %v200_v53, 2  ;;  %v158_v57 = vrot.slane %v157_v54, 1 }
 0x2c5   :  { %v202_v58 = vadd.f32 %v201_v56, %v200_v53  ;;  %v159_v59 = vadd.f32 %v158_v57, %v157_v54 }
 0x2c7   :  { %237 = vpush %v159_v59  ;;  %v203_v61 = vrot.slane %v202_v58, 1 }
 0x2c8   :  { %239 = vpush %v174_v60 }
 0x2c9   :  { %v204_v62 = vadd.f32 %v203_v61, %v202_v58 }
 0x2cb   :  { %241 = vpush %v204_v62 }
 0x2f8   :  { %s238_s0 = spop %237 }
 0x2f9   :  { %v161_v1 = vstv %s238_s0  ;;  %s240_s1 = spop %239 }
 0x2fa   :  { %v162_v2 = vadd.f32 %v161_v1, %v148_v63  ;;  %v176_v3 = vstv %s240_s1 }
 0x2fb   :  { %v177_v4 = vadd.f32 %v176_v3, %v165_v0 }
 0x2fc   :  { %164 = vst.msk [vmem:[#allocation4] sm:$0x1] %vm50_vm4, %v162_v2  ;;  %s242_s19 = spop %241 }
 0x2fd   :  { %178 = vst.msk [vmem:[#allocation5] sm:$0x1] %vm50_vm4, %v177_v4  ;;  %v206_v5 = vstv %s242_s19 }
 0x303   :  { %v209_v8 = vld [vmem:[#allocation4] sm:$0x1] }
 0x304   :  { %v207_v6 = vld [vmem:[#allocation5] sm:$0x1] }
 0x305   :  { %v208_v7 = vsub.f32 %v206_v5, %v207_v6 }
 0x307   :  { %v210_v9 = vadd.f32 %v209_v8, %v208_v7 }
 0x309   :  { %v211_v10 = vmul.f32 0.0625, %v210_v9 }
 0x30b   :  { %212 = vst.msk [vmem:[#allocation11] sm:$0x1] %vm50_vm4, %v211_v10 }
 0x30c   :  { %309 = shalt.err (!%p306_p0)
}
 0x30d   :  { %222 = dma.vmem_to_hbm [thread:$0]  %s220_s21, 16, %s363_s2, [#allocation8]  }
 0x30e   :  { %322 = dma.done.wait [#allocation8], 16  }
 0x30f   :  { %323 = vsyncadd [#allocation8], 4294967280 }
 0x310   :  { %226 = vsyncpa [#allocation7], 1 }
 0x311   :  { %227 = vsyncpa [#allocation10], 1 }
 0x312   :  { %228 = vsyncpa [#allocation8], 1 }

</bundles_post_ra>
